<compile_context>
chip_gen: v5e
topology: v5e:2x2
jax: 0.10.0
libtpu: 0.0.40
codegen_flags: <defaults>
</compile_context>

<pallas_src>
import functools
import math

import jax
import jax.numpy as jnp
from jax.experimental import pallas as pl
from jax.experimental.pallas import tpu as pltpu


_LANE = 1024            # lane width: multiple of 128 -> unmasked, lane-dense stores
_MAX_BLOCK_ROWS = 512   # 512 * 1024 * 4 B = 2 MiB per f32 block (~8 MiB live with
                        # double-buffered in + out: fits default scoped VMEM on
                        # v5e / v6e / v7x without raising vmem_limit_bytes)


def _gaussian_cutoff_kernel(d_ref, o_ref, *, cutoff):
    """Purely elementwise Gaussian cutoff on one (block_rows, _LANE) tile."""
    d = d_ref[...]
    rc = jnp.float32(cutoff)
    rc_eps = jnp.float32(cutoff + 1e-3)          # hoisted scalar: rc + 0.001
    # matches PyTorch: -r**2 / ((rc - r + 0.001) * (rc + r))
    exponent = -(d * d) / ((rc_eps - d) * (rc + d))
    # where-select instead of cast*mul: saves a VPU cast + multiply and avoids
    # inf * 0 -> NaN for d just past the pole at rc + 1e-3.
    # (pl.reciprocal(..., approx=True) would free the EUP divide but loosens
    #  accuracy beyond the 1e-5 test tolerance, so the exact divide is kept.)
    o_ref[...] = jnp.where(d < rc, jnp.exp(exponent), jnp.float32(0.0))


def _round_up(x: int, m: int) -> int:
    return ((x + m - 1) // m) * m


def gaussian_cutoff(distances: jax.Array, cutoff: float = 5.0) -> jax.Array:
    """Elementwise Gaussian cutoff. distances: any shape, float32."""
    orig_shape = distances.shape
    dtype = distances.dtype
    total = math.prod(orig_shape)

    # Flatten to a lane-dense 2D layout (rows, _LANE); pick block rows adaptively
    # (multiple of 8 sublanes, capped at ~2 MiB per block).
    rows_needed = pl.cdiv(total, _LANE)
    block_rows = min(_MAX_BLOCK_ROWS, _round_up(rows_needed, 8))
    rows_padded = _round_up(rows_needed, block_rows)
    padded_total = rows_padded * _LANE

    flat = distances.reshape(-1)
    if padded_total != total:
        flat = jnp.pad(flat, (0, padded_total - total))   # pad values are discarded
    x2d = flat.reshape(rows_padded, _LANE)

    n_blocks = rows_padded // block_rows
    kernel = functools.partial(_gaussian_cutoff_kernel, cutoff=float(cutoff))

    out2d = pl.pallas_call(
        kernel,
        out_shape=jax.ShapeDtypeStruct((rows_padded, _LANE), dtype),
        grid=(n_blocks,),
        in_specs=[pl.BlockSpec((block_rows, _LANE), lambda i: (i, 0))],
        out_specs=pl.BlockSpec((block_rows, _LANE), lambda i: (i, 0)),
        compiler_params=pltpu.CompilerParams(
            dimension_semantics=("parallel",),   # megacore sharding on v7x
        ),
    )(x2d)

    return out2d.reshape(-1)[:total].reshape(orig_shape)


def gaussian_cutoff_ref(distances: jax.Array, cutoff: float = 5.0) -> jax.Array:
    rc = jnp.float32(cutoff)
    exponent = -distances**2 / ((rc - distances + 0.001) * (rc + distances))
    # NaN-safe select: PyTorch's exp()*mask yields NaN (inf*0) just above the
    # pole at rc + 1e-3; the intended value there is 0.
    return jnp.where(distances < rc, jnp.exp(exponent), 0.0).astype(distances.dtype)


# TODO(synk): relprop() (LRP relevance propagation) is a separate backward-style
# helper, not part of the forward pass, and is not implemented here.


if __name__ == "__main__":
    key = jax.random.PRNGKey(0)
    B, A, N = 2, 8, 16
    # interatomic distances in [0, 8) so we cross the cutoff (5.0)
    distances = jax.random.uniform(
        key, (B, A, N), dtype=jnp.float32, minval=0.0, maxval=8.0
    )

    out = jax.block_until_ready(gaussian_cutoff(distances, cutoff=5.0))
    ref = gaussian_cutoff_ref(distances, cutoff=5.0)

    assert out.shape == distances.shape and out.dtype == distances.dtype
    assert bool(jnp.all(jnp.isfinite(out))), "NaN/inf in kernel output"
    assert jnp.allclose(out, ref, atol=1e-6, rtol=1e-5), "mismatch vs reference"

    print("KERNEL_OK")
</pallas_src>

<mosaic_0001>
module attributes {stable_mosaic.version = 11 : i64} {
  func.func @_gaussian_cutoff_kernel(%arg0: i32, %arg1: memref<8x1024xf32, #tpu.memory_space<vmem>>, %arg2: memref<8x1024xf32, #tpu.memory_space<vmem>>) attributes {dimension_semantics = [#tpu.dimension_semantics<parallel>], iteration_bounds = array<i64: 1>, scalar_prefetch = 0 : i64, scratch_operands = 0 : i64, tpu.core_type = #tpu.core_type<tc>, window_params = [{transform_indices = @transform_0, window_bounds = array<i64: 8, 1024>}, {transform_indices = @transform_1, window_bounds = array<i64: 8, 1024>}]} {
    %c0 = arith.constant 0 : index
    %c0_0 = arith.constant 0 : index
    %0 = vector.load %arg1[%c0, %c0_0] : memref<8x1024xf32, #tpu.memory_space<vmem>>, vector<8x1024xf32>
    %1 = arith.mulf %0, %0 : vector<8x1024xf32>
    %cst = arith.constant 0.000000e+00 : f32
    %2 = vector.broadcast %cst : f32 to vector<8x1024xf32>
    %3 = arith.subf %2, %1 : vector<8x1024xf32>
    %cst_1 = arith.constant 5.001000e+00 : f32
    %4 = vector.broadcast %cst_1 : f32 to vector<8x1024xf32>
    %5 = arith.subf %4, %0 : vector<8x1024xf32>
    %cst_2 = arith.constant 5.000000e+00 : f32
    %6 = vector.broadcast %cst_2 : f32 to vector<8x1024xf32>
    %7 = arith.addf %6, %0 : vector<8x1024xf32>
    %8 = arith.mulf %5, %7 : vector<8x1024xf32>
    %9 = arith.divf %3, %8 : vector<8x1024xf32>
    %cst_3 = arith.constant 5.000000e+00 : f32
    %10 = vector.broadcast %cst_3 : f32 to vector<8x1024xf32>
    %11 = arith.cmpf olt, %0, %10 : vector<8x1024xf32>
    %12 = math.exp %9 : vector<8x1024xf32>
    %cst_4 = arith.constant 0.000000e+00 : f32
    %13 = vector.broadcast %cst_4 : f32 to vector<8x1024xf32>
    %14 = arith.select %11, %12, %13 : vector<8x1024xi1>, vector<8x1024xf32>
    %c0_5 = arith.constant 0 : index
    %c0_6 = arith.constant 0 : index
    %15 = vector.load %arg2[%c0_5, %c0_6] : memref<8x1024xf32, #tpu.memory_space<vmem>>, vector<8x1024xf32>
    tpu.vector_store %arg2[%c0_5, %c0_6], %14 {strides = array<i32>} : memref<8x1024xf32, #tpu.memory_space<vmem>>, vector<8x1024xf32>,
    return
  }
  func.func @transform_0(%arg0: i32) -> (i32, i32) {
    %c0_i32 = arith.constant 0 : i32
    %c0_i32_0 = arith.constant 0 : i32
    return %arg0, %c0_i32 : i32, i32
  }
  func.func @transform_1(%arg0: i32) -> (i32, i32) {
    %c0_i32 = arith.constant 0 : i32
    %c0_i32_0 = arith.constant 0 : i32
    return %arg0, %c0_i32 : i32, i32
  }
}

</mosaic_0001>

<bundles_post_ra>
// kernel: tpu_custom_call.1
= control target key start
LH: loop header
LB: loop body
LE: loop exit
PB: predicated region body
PF: predicated region fallthrough
CT: control target
= control target key end

     0   :  { %6 = vsyncpa [#allocation3], 0  ;;  %s532_s0 = inlined_call_operand.hbm [shape: f32[8,1024], index: 0, kind: input, shape index: {}]   ;;  %s533_s1 = inlined_call_operand.hbm [shape: f32[8,1024], index: 1, kind: output, shape index: {}]  }
   0x1   :  { %7 = vsyncpa [#allocation4], 0  ;;  %s13_s8 = sshll.u32 %s532_s0, 4  ;;  %s334_s9 = smov [#allocation2]   ;;  %s14_s8 = int_to_ptr.hbm [resolvable:$true] %s13_s8 }
   0x2   :  { %s15_s10 = sshll.u32 %s334_s9, 4  ;;  %s16_s10 = int_to_ptr.vmem [resolvable:$true] %s15_s10 }
   0x3   :  { %18 = dma.hbm_to_vmem [thread:$0]  %s14_s8, 1024, %s16_s10, [#allocation3]  }
   0x4   :  { %330 = dma.done.wait [#allocation3], 1024  }
   0x5   :  { %331 = vsyncadd [#allocation3], 4294966272  ;;  %v349_v0 = vld [vmem:[#allocation2] sm:$0xff]  ;;  %v351_v1 = vld [vmem:[#allocation2 + $0x8] sm:$0xff]  ;;  %s335_s0 = smov [#allocation5]   ;;  %s238_s14 = sshll.u32 %s533_s1, 4  ;;  %s239_s14 = int_to_ptr.hbm [resolvable:$true] %s238_s14 }
   0x6   :  { %v353_v2 = vld [vmem:[#allocation2 + $0x10] sm:$0xff]  ;;  %v47_v3 = vsub.f32 5.001, %v349_v0  ;;  %v55_v4 = vadd.f32 5.0, %v349_v0  ;;  %v48_v5 = vsub.f32 5.001, %v351_v1  ;;  %v362_v9 = vmul.f32 %v349_v0, %v349_v0 }
   0x7   :  { %v56_v6 = vadd.f32 5.0, %v351_v1  ;;  %v49_v8 = vsub.f32 5.001, %v353_v2  ;;  %v57_v11 = vadd.f32 5.0, %v353_v2  ;;  %v367_v12 = vmul.f32 %v351_v1, %v351_v1  ;;  %v369_v13 = vld [vmem:[#allocation2 + $0x18] sm:$0xff]  ;;  %v379_v21 = vld [vmem:[#allocation2 + $0x20] sm:$0xff] }
   0x8   :  { %v63_v7 = vmul.f32 %v55_v4, %v47_v3  ;;  %v373_v17 = vmul.f32 %v353_v2, %v353_v2  ;;  %v39_v19 = vsub.f32 0.0, %v362_v9  ;;  %v50_v20 = vsub.f32 5.001, %v369_v13  ;;  %v418_v49 = vld [vmem:[#allocation2 + $0x28] sm:$0xff]  ;;  %s236_s11 = sshll.u32 %s335_s0, 4  ;;  %s237_s11 = int_to_ptr.vmem [resolvable:$true] %s236_s11 }
   0x9   :  { %v64_v10 = vmul.f32 %v56_v6, %v48_v5  ;;  %v375_v18 = vmul.f32 %v57_v11, %v49_v8  ;;  %v40_v22 = vsub.f32 0.0, %v367_v12  ;;  %v58_v26 = vadd.f32 5.0, %v369_v13 }
   0xa   :  { %250 = vrcp.f32 %v63_v7  ;;  %v80_v14 = vand.u32 2147483647, %v63_v7  ;;  %v82_v15 = vand.u32 2147483648, %v63_v7  ;;  %vm76_vm0 = vweird.f32 %v63_v7 }
   0xb   :  { %252 = vrcp.f32 %v64_v10  ;;  %v95_v16 = vand.u32 2147483647, %v64_v10  ;;  %vm91_vm1 = vweird.f32 %v64_v10  ;;  %v97_v25 = vand.u32 2147483648, %v64_v10 }
   0xc   :  { %254 = vrcp.f32 %v375_v18  ;;  %vm383_vm2 = vcmp.eq.f32.partialorder %v80_v14, 8.507059e+37  ;;  %v83_v24 = vor.u32 1.1754944e-38, %v82_v15  ;;  %v41_v29 = vsub.f32 0.0, %v373_v17 }
   0xd   :  { %vm388_vm3 = vcmp.eq.f32.partialorder %v95_v16, 8.507059e+37  ;;  %v51_v30 = vsub.f32 5.001, %v379_v21  ;;  %v59_v31 = vadd.f32 5.0, %v379_v21  ;;  %v110_v34 = vand.u32 2147483647, %v375_v18 }
   0xe   :  { %v398_v35 = vmul.f32 %v369_v13, %v369_v13  ;;  %v400_v36 = vmul.f32 %v58_v26, %v50_v20  ;;  %v112_v38 = vand.u32 2147483648, %v375_v18  ;;  %v405_v39 = vmul.f32 %v379_v21, %v379_v21 }
   0xf   :  { %v407_v40 = vmul.f32 %v59_v31, %v51_v30  ;;  %v98_v42 = vor.u32 1.1754944e-38, %v97_v25  ;;  %vm106_vm6 = vweird.f32 %v375_v18  ;;  %vm413_vm7 = vcmp.eq.f32.partialorder %v110_v34, 8.507059e+37  ;;  %v467_v30 = vld [vmem:[#allocation2 + $0x30] sm:$0xff] }
  0x10   :  { %v251_v27 = vpop.eup %250  ;;  %256 = vrcp.f32 %v400_v36  ;;  %v42_v48 = vsub.f32 0.0, %v398_v35  ;;  %v113_v52 = vor.u32 1.1754944e-38, %v112_v38  ;;  %vm121_vm9 = vweird.f32 %v400_v36 }
  0x11   :  { %v253_v32 = vpop.eup %252  ;;  %v72_v33 = vmul.f32 %v251_v27, %v63_v7  ;;  %vm77_vm4 = vweird.f32 %v251_v27  ;;  %258 = vrcp.f32 %v407_v40  ;;  %v43_v53 = vsub.f32 0.0, %v405_v39 }
  0x12   :  { %v87_v37 = vmul.f32 %v253_v32, %v64_v10  ;;  %v255_v43 = vpop.eup %254  ;;  %vm92_vm5 = vweird.f32 %v253_v32  ;;  %vm421_vm8 = vmor %vm76_vm0, %vm77_vm4  ;;  %v125_v57 = vand.u32 2147483647, %v400_v36  ;;  %v127_v59 = vand.u32 2147483648, %v400_v36 }
  0x13   :  { %v73_v41 = vsub.f32 1.0, %v72_v33  ;;  %v102_v46 = vmul.f32 %v255_v43, %v375_v18  ;;  %vm428_vm10 = vmor %vm91_vm1, %vm92_vm5  ;;  %vm107_vm11 = vweird.f32 %v255_v43  ;;  %v52_v60 = vsub.f32 5.001, %v418_v49 }
  0x14   :  { %v88_v44 = vsub.f32 1.0, %v87_v37  ;;  %v60_v61 = vadd.f32 5.0, %v418_v49  ;;  %vm136_vm12 = vweird.f32 %v407_v40  ;;  %v140_v4 = vand.u32 2147483647, %v407_v40  ;;  %vm446_vm13 = vmor %vm106_vm6, %vm107_vm11 }
  0x15   :  { %v74_v45 = vmul.f32 %v251_v27, %v73_v41  ;;  %v103_v56 = vsub.f32 1.0, %v102_v46  ;;  %v142_v11 = vand.u32 2147483648, %v407_v40  ;;  %vm191_vm14 = vcmp.lt.f32.partialorder %v349_v0, 5.0 }
  0x16   :  { %v89_v51 = vmul.f32 %v253_v32, %v88_v44  ;;  %v257_v62 = vpop.eup %256  ;;  %v128_v31 = vor.u32 1.1754944e-38, %v127_v59  ;;  %vm141_vm4 = vcmp.eq.f32.partialorder %v140_v4, 8.507059e+37  ;;  %vm192_vm5 = vcmp.lt.f32.partialorder %v351_v1, 5.0  ;;  %v493_v44 = vld [vmem:[#allocation2 + $0x38] sm:$0xff] }
  0x17   :  { %v75_v54 = vadd.f32 %v251_v27, %v74_v45  ;;  %v104_v3 = vmul.f32 %v255_v43, %v103_v56  ;;  %v259_v5 = vpop.eup %258  ;;  %v117_v10 = vmul.f32 %v257_v62, %v400_v36  ;;  %vm122_vm15 = vweird.f32 %v257_v62 }
  0x18   :  { %v90_v58 = vadd.f32 %v253_v32, %v89_v51  ;;  %v132_v20 = vmul.f32 %v259_v5, %v407_v40  ;;  %vm137_vm0 = vweird.f32 %v259_v5  ;;  %vm473_vm1 = vmor %vm121_vm9, %vm122_vm15  ;;  %v143_v37 = vor.u32 1.1754944e-38, %v142_v11 }
  0x19   :  { %v79_v63 = vsel %vm421_vm8, %v251_v27, %v75_v54  ;;  %v105_v16 = vadd.f32 %v255_v43, %v104_v3  ;;  %v118_v23 = vsub.f32 1.0, %v117_v10  ;;  %v53_v36 = vsub.f32 5.001, %v467_v30 }
  0x1a   :  { %v84_v6 = vsel %vm383_vm2, %v83_v24, %v79_v63  ;;  %v94_v7 = vsel %vm428_vm10, %v253_v32, %v90_v58  ;;  %v460_v24 = vmul.f32 %v60_v61, %v52_v60  ;;  %vm126_vm2 = vcmp.eq.f32.partialorder %v125_v57, 8.507059e+37 }
  0x1b   :  { %v85_v14 = vmul.f32 %v84_v6, %v39_v19  ;;  %v99_v15 = vsel %vm388_vm3, %v98_v42, %v94_v7  ;;  %v109_v9 = vsel %vm446_vm13, %v255_v43, %v105_v16  ;;  %v133_v19 = vsub.f32 1.0, %v132_v20  ;;  %vm479_vm3 = vmor %vm136_vm12, %vm137_vm0 }
  0x1c   :  { %v100_v18 = vmul.f32 %v99_v15, %v40_v22  ;;  %v114_v27 = vsel %vm413_vm7, %v113_v52, %v109_v9  ;;  %v119_v28 = vmul.f32 %v257_v62, %v118_v23  ;;  %260 = vrcp.f32 %v460_v24 }
  0x1d   :  { %v199_v25 = vmul.f32 1.442695, %v85_v14  ;;  %v115_v12 = vmul.f32 %v114_v27, %v41_v29  ;;  %v134_v32 = vmul.f32 %v259_v5, %v133_v19  ;;  %vm193_vm6 = vcmp.lt.f32.partialorder %v353_v2, 5.0 }
  0x1e   :  { %v201_v26 = vmul.f32 1.442695, %v100_v18  ;;  %v120_v33 = vadd.f32 %v257_v62, %v119_v28  ;;  %v61_v41 = vadd.f32 5.0, %v467_v30  ;;  %v36_v43 = vmul.f32 %v418_v49, %v418_v49 }
  0x1f   :  { %262 = vpow2.f32 %v199_v25  ;;  %v203_v17 = vmul.f32 1.442695, %v115_v12  ;;  %v135_v29 = vadd.f32 %v259_v5, %v134_v32  ;;  %vm151_vm7 = vweird.f32 %v460_v24 }
  0x20   :  { %264 = vpow2.f32 %v201_v26  ;;  %v124_v38 = vsel %vm473_vm1, %v257_v62, %v120_v33  ;;  %v69_v50 = vmul.f32 %v61_v41, %v53_v36  ;;  %v155_v55 = vand.u32 2147483647, %v460_v24 }
  0x21   :  { %266 = vpow2.f32 %v203_v17  ;;  %v129_v40 = vsel %vm126_vm2, %v128_v31, %v124_v38  ;;  %v139_v42 = vsel %vm479_vm3, %v259_v5, %v135_v29  ;;  %v157_v56 = vand.u32 2147483648, %v460_v24 }
  0x22   :  { %v261_v45 = vpop.eup %260  ;;  %v130_v46 = vmul.f32 %v129_v40, %v42_v48  ;;  %v144_v47 = vsel %vm141_vm4, %v143_v37, %v139_v42  ;;  %268 = vrcp.f32 %v69_v50  ;;  %v54_v48 = vsub.f32 5.001, %v493_v44 }
  0x23   :  { %v145_v52 = vmul.f32 %v144_v47, %v43_v53  ;;  %v147_v54 = vmul.f32 %v261_v45, %v460_v24  ;;  %vm152_vm8 = vweird.f32 %v261_v45  ;;  %v62_v60 = vadd.f32 5.0, %v493_v44 }
  0x24   :  { %v205_v35 = vmul.f32 1.442695, %v130_v46  ;;  %vm513_vm9 = vmor %vm151_vm7, %vm152_vm8  ;;  %v158_v1 = vor.u32 1.1754944e-38, %v157_v56  ;;  %v44_v4 = vsub.f32 0.0, %v36_v43  ;;  %vm156_vm10 = vcmp.eq.f32.partialorder %v155_v55, 8.507059e+37 }
  0x25   :  { %v263_v51 = vpop.eup %262  ;;  %v207_v39 = vmul.f32 1.442695, %v145_v52  ;;  %v148_v53 = vsub.f32 1.0, %v147_v54  ;;  %v70_v3 = vmul.f32 %v62_v60, %v54_v48  ;;  %vm194_vm11 = vcmp.lt.f32.partialorder %v369_v13, 5.0 }
  0x26   :  { %v265_v57 = vpop.eup %264  ;;  %v215_v58 = vsel %vm191_vm14, %v263_v51, 0.0  ;;  %270 = vpow2.f32 %v205_v35  ;;  %vm195_vm12 = vcmp.lt.f32.partialorder %v379_v21, 5.0  ;;  %v37_v7 = vmul.f32 %v467_v30, %v467_v30 }
  0x27   :  { %223 = vst [vmem:[#allocation5] sm:$0xff] %v215_v58  ;;  %v216_v59 = vsel %vm192_vm5, %v265_v57, 0.0  ;;  %v267_v61 = vpop.eup %266  ;;  %272 = vpow2.f32 %v207_v39  ;;  %v149_v62 = vmul.f32 %v261_v45, %v148_v53  ;;  %vm166_vm13 = vweird.f32 %v69_v50 }
  0x28   :  { %224 = vst [vmem:[#allocation5 + $0x8] sm:$0xff] %v216_v59  ;;  %v217_v0 = vsel %vm193_vm6, %v267_v61, 0.0  ;;  %v269_v6 = vpop.eup %268  ;;  %274 = vrcp.f32 %v70_v3  ;;  %v170_v14 = vand.u32 2147483647, %v69_v50  ;;  %v172_v15 = vand.u32 2147483648, %v69_v50 }
  0x29   :  { %225 = vst [vmem:[#allocation5 + $0x10] sm:$0xff] %v217_v0  ;;  %v150_v5 = vadd.f32 %v261_v45, %v149_v62  ;;  %v162_v8 = vmul.f32 %v269_v6, %v69_v50  ;;  %vm167_vm14 = vweird.f32 %v269_v6  ;;  %v45_v9 = vsub.f32 0.0, %v37_v7 }
  0x2a   :  { %vm168_vm15 = vmor %vm166_vm13, %vm167_vm14  ;;  %v173_v19 = vor.u32 1.1754944e-38, %v172_v15  ;;  %vm171_vm0 = vcmp.eq.f32.partialorder %v170_v14, 8.507059e+37  ;;  %v38_v28 = vmul.f32 %v493_v44, %v493_v44  ;;  %vm181_vm1 = vweird.f32 %v70_v3 }
  0x2b   :  { %v154_v2 = vsel %vm513_vm9, %v261_v45, %v150_v5  ;;  %v163_v23 = vsub.f32 1.0, %v162_v8  ;;  %v187_v12 = vand.u32 2147483648, %v70_v3  ;;  %v185_v32 = vand.u32 2147483647, %v70_v3 }
  0x2c   :  { %v271_v10 = vpop.eup %270  ;;  %v159_v11 = vsel %vm156_vm10, %v158_v1, %v154_v2  ;;  %vm196_vm3 = vcmp.lt.f32.partialorder %v418_v49, 5.0  ;;  %v46_v38 = vsub.f32 0.0, %v38_v28  ;;  %vm197_vm6 = vcmp.lt.f32.partialorder %v467_v30, 5.0 }
  0x2d   :  { %v273_v16 = vpop.eup %272  ;;  %v218_v20 = vsel %vm194_vm11, %v271_v10, 0.0  ;;  %v160_v18 = vmul.f32 %v159_v11, %v44_v4  ;;  %v164_v24 = vmul.f32 %v269_v6, %v163_v23  ;;  %v188_v17 = vor.u32 1.1754944e-38, %v187_v12 }
  0x2e   :  { %226 = vst [vmem:[#allocation5 + $0x18] sm:$0xff] %v218_v20  ;;  %v219_v13 = vsel %vm195_vm12, %v273_v16, 0.0  ;;  %v275_v25 = vpop.eup %274  ;;  %vm186_vm5 = vcmp.eq.f32.partialorder %v185_v32, 8.507059e+37  ;;  %vm198_vm7 = vcmp.lt.f32.partialorder %v493_v44, 5.0 }
  0x2f   :  { %227 = vst [vmem:[#allocation5 + $0x20] sm:$0xff] %v219_v13  ;;  %v209_v21 = vmul.f32 1.442695, %v160_v18  ;;  %v165_v26 = vadd.f32 %v269_v6, %v164_v24  ;;  %v177_v27 = vmul.f32 %v275_v25, %v70_v3  ;;  %vm182_vm2 = vweird.f32 %v275_v25 }
  0x30   :  { %vm183_vm4 = vmor %vm181_vm1, %vm182_vm2 }
  0x31   :  { %276 = vpow2.f32 %v209_v21  ;;  %v169_v22 = vsel %vm168_vm15, %v269_v6, %v165_v26  ;;  %v178_v31 = vsub.f32 1.0, %v177_v27 }
  0x32   :  { %v174_v33 = vsel %vm171_vm0, %v173_v19, %v169_v22 }
  0x33   :  { %v175_v34 = vmul.f32 %v174_v33, %v45_v9  ;;  %v179_v37 = vmul.f32 %v275_v25, %v178_v31 }
  0x35   :  { %v211_v36 = vmul.f32 1.442695, %v175_v34  ;;  %v180_v41 = vadd.f32 %v275_v25, %v179_v37 }
  0x37   :  { %v277_v29 = vpop.eup %276  ;;  %278 = vpow2.f32 %v211_v36  ;;  %v184_v42 = vsel %vm183_vm4, %v275_v25, %v180_v41 }
  0x38   :  { %v220_v40 = vsel %vm196_vm3, %v277_v29, 0.0  ;;  %v189_v43 = vsel %vm186_vm5, %v188_v17, %v184_v42 }
  0x39   :  { %228 = vst [vmem:[#allocation5 + $0x28] sm:$0xff] %v220_v40  ;;  %v190_v45 = vmul.f32 %v189_v43, %v46_v38 }
  0x3b   :  { %v213_v46 = vmul.f32 1.442695, %v190_v45 }
  0x3d   :  { %v279_v47 = vpop.eup %278  ;;  %280 = vpow2.f32 %v213_v46 }
  0x3e   :  { %v221_v49 = vsel %vm197_vm6, %v279_v47, 0.0 }
  0x3f   :  { %229 = vst [vmem:[#allocation5 + $0x30] sm:$0xff] %v221_v49 }
  0x43   :  { %v281_v50 = vpop.eup %280 }
  0x44   :  { %v222_v51 = vsel %vm198_vm7, %v281_v50, 0.0 }
  0x45   :  { %230 = vst [vmem:[#allocation5 + $0x38] sm:$0xff] %v222_v51 }
  0x46   :  { %241 = dma.vmem_to_hbm [thread:$0]  %s237_s11, 1024, %s239_s14, [#allocation4]  }
  0x47   :  { %332 = dma.done.wait [#allocation4], 1024  }
  0x48   :  { %333 = vsyncadd [#allocation4], 4294966272 }
  0x49   :  { %246 = vsyncpa [#allocation3], 1 }
  0x4a   :  { %247 = vsyncpa [#allocation4], 1 }

</bundles_post_ra>
